<compile_context>
chip_gen: v6e
topology: v6e:2x2x1
jax: 0.10.0
libtpu: 0.0.40
codegen_flags: <defaults>
</compile_context>

<pallas_src>
import jax
import jax.numpy as jnp
from jax.experimental import pallas as pl
from jax.experimental.pallas import tpu as pltpu

_BN_EPS = 1e-5
_FOLD_MAX_CI = 64           # width-folded weights only pay off for small Ci
_FOLD_MAX_BYTES = 4 << 20   # and only while the folded weight stays small


# ---------------------------------------------------------------------------
# VMEM / tiling helpers (padded footprint math, per-generation budget)
# ---------------------------------------------------------------------------
def _padded_nbytes(shape, dtype):
    """VMEM bytes of one block after (sublane, lane) tile padding."""
    dtype = jnp.dtype(dtype)
    dims = [int(d) for d in shape]
    if len(dims) < 2:
        dims = [1] * (2 - len(dims)) + dims
    packing = max(1, 4 // dtype.itemsize)          # f32:1, bf16:2
    sub = -(-dims[-2] // (8 * packing)) * (8 * packing)
    lane = -(-dims[-1] // 128) * 128
    lead = 1
    for d in dims[:-2]:
        lead *= d
    return lead * sub * lane * dtype.itemsize


def _vmem_cap():
    """Per-generation scoped-VMEM budget (~3/4 of physical, >= 32 MiB)."""
    try:
        phys = int(pltpu.get_tpu_info().vmem_capacity_bytes)
    except Exception:
        phys = 64 * 2**20                           # conservative: v7x per-core
    return max(32 * 2**20, (phys * 3) // 4)


def _compiler_params(blocks, n_grid_dims=1):
    """blocks: list of (shape, dtype) handled per grid step (padded math)."""
    per_step = sum(_padded_nbytes(s, d) for s, d in blocks)
    # 2x for double-buffering + 2x headroom for in-kernel f32 temporaries.
    limit = int(min(_vmem_cap(), max(16 * 2**20, 4 * per_step)))
    return pltpu.CompilerParams(
        dimension_semantics=("parallel",) * n_grid_dims,
        vmem_limit_bytes=limit,
    )


def _pick_row_block(rows, lanes):
    """Largest multiple-of-8 divisor of `rows` whose blocks fit the budget."""
    budget = _vmem_cap() // 2
    best = None
    rb = 8
    while rb <= min(rows, 4096):
        if rows % rb == 0:
            need = 4 * _padded_nbytes((rb, lanes), jnp.float32)  # 2 bufs x (in+out)
            if need <= budget:
                best = rb
        rb += 8
    if best is None:
        # Full extent is always a legal block shape.
        # TODO(synk): pad `rows` to a multiple of 8 so awkward row counts on
        # very large arrays can still be tiled under the VMEM budget.
        best = rows
    return best


# ---------------------------------------------------------------------------
# Weight preparation
# ---------------------------------------------------------------------------
def _use_folding(width, ci, co):
    wo = width - 2
    return ci <= _FOLD_MAX_CI and 3 * width * ci * wo * co * 2 <= _FOLD_MAX_BYTES


def _fold_conv_weights(w_oihw, width):
    """(Co,Ci,3,3) -> (3, width*Ci, (width-2)*Co) bf16 width-folded weights.

    folded[dy, xin*Ci + c, xout*Co + f] = w[f, c, dy, xin - xout] when
    0 <= xin - xout < 3 (else 0), so each conv becomes
        y2d = sum_dy  x2d[dy : dy+Hout, :] @ folded[dy]
    with x2d / y2d in the fused lane-dense (row, W*C) layout.
    """
    co, ci, kh, kw = w_oihw.shape
    wo = width - kw + 1
    w_hwio = jnp.transpose(w_oihw.astype(jnp.float32), (2, 3, 1, 0))  # (kh,kw,ci,co)
    dx = jnp.arange(width)[:, None] - jnp.arange(wo)[None, :]         # (width, wo)
    valid = (dx >= 0) & (dx < kw)
    taps = w_hwio[:, jnp.clip(dx, 0, kw - 1)]                         # (kh,width,wo,ci,co)
    taps = jnp.where(valid[None, :, :, None, None], taps, 0.0)
    folded = jnp.transpose(taps, (0, 1, 3, 2, 4)).reshape(kh, width * ci, wo * co)
    return folded.astype(jnp.bfloat16)


def prepare_double_conv_params(w1_oihw, g1, b1, w2_oihw, g2, b2):
    """One-time parameter prep (hoisted out of the per-call path).

    Width-folded matrices depend on the image width, so they are built (very
    cheaply) inside the jitted forward; the flat (9*Ci, Co) matrices for the
    large-Ci fallback are prepared here.
    """
    def conv_mat(w):
        co, ci, kh, kw = w.shape
        # OIHW -> (kw, kh, ci, co) -> (9*Ci, Co); row index = (dx*3 + dy)*Ci + ci
        return (jnp.transpose(w, (3, 2, 1, 0))
                .reshape(kh * kw * ci, co)
                .astype(jnp.bfloat16))

    return dict(
        w1_oihw=jnp.asarray(w1_oihw, jnp.float32), w1_mat=conv_mat(w1_oihw),
        g1=jnp.asarray(g1, jnp.float32), b1=jnp.asarray(b1, jnp.float32),
        w2_oihw=jnp.asarray(w2_oihw, jnp.float32), w2_mat=conv_mat(w2_oihw),
        g2=jnp.asarray(g2, jnp.float32), b2=jnp.asarray(b2, jnp.float32),
    )


# ---------------------------------------------------------------------------
# In-kernel conv strategies (both consume / produce the fused lane-dense view)
# ---------------------------------------------------------------------------
def _conv3x3_folded(x2d, w_ref):
    """Small-Ci path: 3 sublane slices + 3 MXU matmuls, zero relayouts.

    x2d: (h, W*Ci) bf16; w_ref: (3, W*Ci, Wo*Co) bf16.  Returns (h-2, Wo*Co) f32.
    """
    ho = x2d.shape[0] - 2
    acc = jnp.dot(x2d[0:ho], w_ref[0], preferred_element_type=jnp.float32)
    acc = acc + jnp.dot(x2d[1:ho + 1], w_ref[1], preferred_element_type=jnp.float32)
    acc = acc + jnp.dot(x2d[2:ho + 2], w_ref[2], preferred_element_type=jnp.float32)
    return acc


def _conv3x3_shifted(x2d, w_ref):
    """Large-Ci fallback: nine full-K (K=Ci) shifted-slice matmuls.

    x2d: (h, W*Ci) bf16; w_ref: (9*Ci, Co) bf16.  Returns (h-2, Wo*Co) f32.
    (Not exercised at the test sizes; used when width-folding would be huge.)
    """
    ci, co = w_ref.shape[0] // 9, w_ref.shape[1]
    h = x2d.shape[0]
    width = x2d.shape[1] // ci
    ho, wo = h - 2, width - 2
    x3 = x2d.reshape(h, width, ci)
    acc = jnp.zeros((ho * wo, co), jnp.float32)
    for dx in range(3):
        for dy in range(3):
            tap = w_ref[(dx * 3 + dy) * ci:(dx * 3 + dy + 1) * ci, :]
            xs = x3[dy:dy + ho, dx:dx + wo, :].reshape(ho * wo, ci)
            acc = acc + jnp.dot(xs, tap, preferred_element_type=jnp.float32)
    return acc.reshape(ho, wo * co)


# ---------------------------------------------------------------------------
# Kernels
# ---------------------------------------------------------------------------
def _conv_body(x2d, w_ref, y_ref, s_ref, conv_fn):
    """conv -> per-(output-column) [sum, centered SS] from the f32 accumulator
    -> lane-dense store (cast only at the store)."""
    acc = conv_fn(x2d, w_ref)                              # (ho, Wo*Co) f32
    ho = acc.shape[0]
    colsum = jnp.sum(acc, axis=0, keepdims=True)           # (1, Wo*Co)
    mu = colsum * (1.0 / ho)
    css = jnp.sum(jnp.square(acc - mu), axis=0, keepdims=True)
    s_ref[0] = jnp.concatenate([colsum, css], axis=0)      # (2, Wo*Co)
    y_ref[0] = acc.astype(y_ref.dtype)


def _make_conv_stats_kernel(conv_fn):
    def kernel(x_ref, w_ref, y_ref, s_ref):
        _conv_body(x_ref[0], w_ref, y_ref, s_ref, conv_fn)
    return kernel


def _make_bn_relu_conv_stats_kernel(conv_fn):
    def kernel(x_ref, aff_ref, w_ref, y_ref, s_ref):
        # Folded BN + ReLU applied on the fused lane-dense layout (f32 VPU),
        # cast to bf16 *before* the conv so all conv-side data is half width.
        a = jnp.maximum(
            x_ref[0].astype(jnp.float32) * aff_ref[0:1, :] + aff_ref[1:2, :], 0.0
        ).astype(jnp.bfloat16)
        _conv_body(a, w_ref, y_ref, s_ref, conv_fn)
    return kernel


def _bn_relu_kernel(y_ref, aff_ref, o_ref):
    """Folded BN2 + ReLU on a lane-dense (rows, W2*Co) view."""
    o_ref[...] = jnp.maximum(y_ref[...] * aff_ref[0:1, :] + aff_ref[1:2, :], 0.0)


# ---------------------------------------------------------------------------
# BatchNorm folding (parallel-variance combine of per-tile partial stats)
# ---------------------------------------------------------------------------
def _fold_bn(stats, gamma, beta, *, rows, wo, co):
    """stats: (N, 2, wo*co) f32, per-(sample, output column) [sum, centered SS]
    over `rows` elements.  Returns per-channel (scale, shift) for the folded
    training-mode BatchNorm (biased variance, matching PyTorch normalization)."""
    s = stats.reshape(stats.shape[0], 2, wo, co)
    sums, css = s[:, 0], s[:, 1]                   # (N, wo, co)
    cnt = rows
    total_cnt = stats.shape[0] * wo * cnt
    mean = jnp.sum(sums, axis=(0, 1)) / total_cnt  # (co,)
    mu_g = sums / cnt
    var = (jnp.sum(css, axis=(0, 1))
           + cnt * jnp.sum(jnp.square(mu_g - mean), axis=(0, 1))) / total_cnt
    var = jnp.maximum(var, 0.0)
    scale = gamma * jax.lax.rsqrt(var + _BN_EPS)
    shift = beta - mean * scale
    return scale, shift


# ---------------------------------------------------------------------------
# Per-layer pallas_call wrapper (conv [+BN/ReLU] + stats)
# ---------------------------------------------------------------------------
def _conv_layer_call(x2d, wk, aff, *, use_folded, co, y_dtype):
    n, h, wci = x2d.shape
    ho = h - 2
    if use_folded:
        woco = wk.shape[2]
        w_spec = pl.BlockSpec(wk.shape, lambda i: (0, 0, 0))
        conv_fn = _conv3x3_folded
    else:
        ci = wk.shape[0] // 9
        woco = (wci // ci - 2) * co
        w_spec = pl.BlockSpec(wk.shape, lambda i: (0, 0))
        conv_fn = _conv3x3_shifted

    blocks = [((1, h, wci), x2d.dtype), (wk.shape, jnp.bfloat16),
              ((1, ho, woco), y_dtype), ((1, 2, woco), jnp.float32)]

    if aff is None:
        kernel = _make_conv_stats_kernel(conv_fn)
        in_specs = [pl.BlockSpec((1, h, wci), lambda i: (i, 0, 0)), w_spec]
        args = (x2d, wk)
    else:
        kernel = _make_bn_relu_conv_stats_kernel(conv_fn)
        in_specs = [pl.BlockSpec((1, h, wci), lambda i: (i, 0, 0)),
                    pl.BlockSpec(aff.shape, lambda i: (0, 0)),
                    w_spec]
        args = (x2d, aff, wk)
        blocks.append((aff.shape, jnp.float32))

    y, stats = pl.pallas_call(
        kernel,
        grid=(n,),
        in_specs=in_specs,
        out_specs=(pl.BlockSpec((1, ho, woco), lambda i: (i, 0, 0)),
                   pl.BlockSpec((1, 2, woco), lambda i: (i, 0, 0))),
        out_shape=(jax.ShapeDtypeStruct((n, ho, woco), y_dtype),
                   jax.ShapeDtypeStruct((n, 2, woco), jnp.float32)),
        compiler_params=_compiler_params(blocks),
    )(*args)
    return y, stats


# ---------------------------------------------------------------------------
# Forward pass
# ---------------------------------------------------------------------------
@jax.jit
def double_conv2d_nhwc(x_nhwc, params):
    """DoubleConv2d forward for NHWC input / NHWC output (no layout transposes)."""
    n, h, w, ci = x_nhwc.shape
    co = params["g1"].shape[0]
    h1, w1 = h - 2, w - 2
    h2, w2 = h - 4, w - 4

    # Lane-dense, bf16 HBM view of the input (free reshape, halves x traffic).
    x2d = x_nhwc.astype(jnp.bfloat16).reshape(n, h, w * ci)

    # ---- call 1: conv1 + partial BN1 statistics ----------------------------
    fold1 = _use_folding(w, ci, co)
    w1k = _fold_conv_weights(params["w1_oihw"], w) if fold1 else params["w1_mat"]
    y1, s1 = _conv_layer_call(x2d, w1k, None, use_folded=fold1, co=co,
                              y_dtype=jnp.bfloat16)

    scale1, shift1 = _fold_bn(s1, params["g1"], params["b1"], rows=h1, wo=w1, co=co)
    aff1 = jnp.stack([jnp.tile(scale1, w1), jnp.tile(shift1, w1)])   # (2, W1*Co)

    # ---- call 2: folded BN1 + ReLU + conv2 + partial BN2 statistics --------
    fold2 = _use_folding(w1, co, co)
    w2k = _fold_conv_weights(params["w2_oihw"], w1) if fold2 else params["w2_mat"]
    y2, s2 = _conv_layer_call(y1, w2k, aff1, use_folded=fold2, co=co,
                              y_dtype=jnp.float32)

    scale2, shift2 = _fold_bn(s2, params["g2"], params["b2"], rows=h2, wo=w2, co=co)
    aff2 = jnp.stack([jnp.tile(scale2, w2), jnp.tile(shift2, w2)])   # (2, W2*Co)

    # ---- call 3: folded BN2 + ReLU on the lane-dense (N*H2, W2*Co) view ----
    rows, lanes = n * h2, w2 * co
    y2v = y2.reshape(rows, lanes)                                    # free reshape
    rb = _pick_row_block(rows, lanes)
    out_v = pl.pallas_call(
        _bn_relu_kernel,
        grid=(rows // rb,),
        in_specs=[pl.BlockSpec((rb, lanes), lambda i: (i, 0)),
                  pl.BlockSpec((2, lanes), lambda i: (0, 0))],
        out_specs=pl.BlockSpec((rb, lanes), lambda i: (i, 0)),
        out_shape=jax.ShapeDtypeStruct((rows, lanes), jnp.float32),
        compiler_params=_compiler_params(
            [((rb, lanes), jnp.float32), ((2, lanes), jnp.float32),
             ((rb, lanes), jnp.float32)]),
    )(y2v, aff2)

    return out_v.reshape(n, h2, w2, co)


@jax.jit
def double_conv2d(x_nchw, params):
    """NCHW front-end matching the PyTorch module.  For UNet-style chains
    prefer double_conv2d_nhwc to avoid the two full-array layout transposes."""
    x = jnp.transpose(x_nchw, (0, 2, 3, 1)).astype(jnp.float32)
    out = double_conv2d_nhwc(x, params)
    return jnp.transpose(out, (0, 3, 1, 2))


# ---------------------------------------------------------------------------
# Pure-JAX reference (f32) for a loose numerical self-check.
# ---------------------------------------------------------------------------
@jax.jit
def _reference(x, w1, g1, b1, w2, g2, b2):
    def conv(inp, w):
        return jax.lax.conv_general_dilated(
            inp, w, window_strides=(1, 1), padding="VALID",
            dimension_numbers=("NCHW", "OIHW", "NCHW"))

    def bn_relu(y, g, b):
        mean = jnp.mean(y, axis=(0, 2, 3), keepdims=True)
        var = jnp.mean((y - mean) ** 2, axis=(0, 2, 3), keepdims=True)
        yn = (y - mean) * jax.lax.rsqrt(var + _BN_EPS)
        return jnp.maximum(yn * g.reshape(1, -1, 1, 1) + b.reshape(1, -1, 1, 1), 0.0)

    return bn_relu(conv(bn_relu(conv(x, w1), g1, b1), w2), g2, b2)


if __name__ == "__main__":
    in_channels, out_channels = 4, 8
    N, H, W = 2, 16, 16

    key = jax.random.PRNGKey(0)
    kx, kw1, kw2 = jax.random.split(key, 3)

    x = jax.random.normal(kx, (N, in_channels, H, W), jnp.float32)
    w1 = 0.1 * jax.random.normal(kw1, (out_channels, in_channels, 3, 3), jnp.float32)
    w2 = 0.1 * jax.random.normal(kw2, (out_channels, out_channels, 3, 3), jnp.float32)
    g1 = jnp.ones((out_channels,), jnp.float32)
    b1 = jnp.zeros((out_channels,), jnp.float32)
    g2 = jnp.ones((out_channels,), jnp.float32)
    b2 = jnp.zeros((out_channels,), jnp.float32)

    params = prepare_double_conv_params(w1, g1, b1, w2, g2, b2)   # hoisted prep
    out = jax.block_until_ready(double_conv2d(x, params))

    assert out.shape == (N, out_channels, H - 4, W - 4), out.shape

    # Loose check vs f32 reference (kernels use bf16 MXU inputs / bf16 y1
    # storage with f32 accumulation everywhere).
    ref = jax.block_until_ready(_reference(x, w1, g1, b1, w2, g2, b2))
    max_err = float(jnp.max(jnp.abs(out - ref)))
    assert max_err < 7.5e-2, f"max abs error vs reference: {max_err}"

    print("KERNEL_OK")
</pallas_src>

<mosaic_0001>
module attributes {stable_mosaic.version = 11 : i64} {
  func.func @kernel(%arg0: i32, %arg1: memref<1x16x64xbf16, #tpu.memory_space<vmem>>, %arg2: memref<3x64x112xbf16, #tpu.memory_space<vmem>>, %arg3: memref<1x14x112xbf16, #tpu.memory_space<vmem>>, %arg4: memref<1x2x112xf32, #tpu.memory_space<vmem>>) attributes {dimension_semantics = [#tpu.dimension_semantics<parallel>], iteration_bounds = array<i64: 2>, scalar_prefetch = 0 : i64, scratch_operands = 0 : i64, tpu.core_type = #tpu.core_type<tc>, window_params = [{transform_indices = @transform_0, window_bounds = array<i64: 1, 16, 64>}, {pipeline_mode = #tpu.pipeline_mode<synchronous>, transform_indices = @transform_1, window_bounds = array<i64: 3, 64, 112>}, {transform_indices = @transform_2, window_bounds = array<i64: 1, 14, 112>}, {transform_indices = @transform_3, window_bounds = array<i64: 1, 2, 112>}]} {
    %c0 = arith.constant 0 : index
    %c0_0 = arith.constant 0 : index
    %c0_1 = arith.constant 0 : index
    %0 = vector.load %arg1[%c0, %c0_0, %c0_1] : memref<1x16x64xbf16, #tpu.memory_space<vmem>>, vector<1x16x64xbf16>
    %1 = vector.shape_cast %0 : vector<1x16x64xbf16> to vector<16x64xbf16>
    %2 = vector.extract_strided_slice %1 {offsets = [0, 0], sizes = [14, 64], strides = [1, 1]} : vector<16x64xbf16> to vector<14x64xbf16>
    %c0_2 = arith.constant 0 : index
    %c0_3 = arith.constant 0 : index
    %c0_4 = arith.constant 0 : index
    %3 = vector.load %arg2[%c0_2, %c0_3, %c0_4] : memref<3x64x112xbf16, #tpu.memory_space<vmem>>, vector<1x64x112xbf16>
    %4 = vector.shape_cast %3 : vector<1x64x112xbf16> to vector<64x112xbf16>
    %cst = arith.constant dense<0.000000e+00> : vector<14x112xf32>
    %5 = tpu.matmul %2, %4, %cst {dimension_numbers = #tpu.dot_dimension_numbers<[1], [0], [0], [1], [0, 0, 1, 1], [], []>} : vector<14x64xbf16>, vector<64x112xbf16>, vector<14x112xf32> -> vector<14x112xf32>
    %6 = vector.extract_strided_slice %1 {offsets = [1, 0], sizes = [14, 64], strides = [1, 1]} : vector<16x64xbf16> to vector<14x64xbf16>
    %c1 = arith.constant 1 : index
    %c0_5 = arith.constant 0 : index
    %c0_6 = arith.constant 0 : index
    %7 = vector.load %arg2[%c1, %c0_5, %c0_6] : memref<3x64x112xbf16, #tpu.memory_space<vmem>>, vector<1x64x112xbf16>
    %8 = vector.shape_cast %7 : vector<1x64x112xbf16> to vector<64x112xbf16>
    %cst_7 = arith.constant dense<0.000000e+00> : vector<14x112xf32>
    %9 = tpu.matmul %6, %8, %cst_7 {dimension_numbers = #tpu.dot_dimension_numbers<[1], [0], [0], [1], [0, 0, 1, 1], [], []>} : vector<14x64xbf16>, vector<64x112xbf16>, vector<14x112xf32> -> vector<14x112xf32>
    %10 = arith.addf %5, %9 : vector<14x112xf32>
    %11 = vector.extract_strided_slice %1 {offsets = [2, 0], sizes = [14, 64], strides = [1, 1]} : vector<16x64xbf16> to vector<14x64xbf16>
    %c2 = arith.constant 2 : index
    %c0_8 = arith.constant 0 : index
    %c0_9 = arith.constant 0 : index
    %12 = vector.load %arg2[%c2, %c0_8, %c0_9] : memref<3x64x112xbf16, #tpu.memory_space<vmem>>, vector<1x64x112xbf16>
    %13 = vector.shape_cast %12 : vector<1x64x112xbf16> to vector<64x112xbf16>
    %cst_10 = arith.constant dense<0.000000e+00> : vector<14x112xf32>
    %14 = tpu.matmul %11, %13, %cst_10 {dimension_numbers = #tpu.dot_dimension_numbers<[1], [0], [0], [1], [0, 0, 1, 1], [], []>} : vector<14x64xbf16>, vector<64x112xbf16>, vector<14x112xf32> -> vector<14x112xf32>
    %15 = arith.addf %10, %14 : vector<14x112xf32>
    %cst_11 = arith.constant dense<0.000000e+00> : vector<112xf32>
    %16 = vector.multi_reduction <add>, %15, %cst_11 [0] : vector<14x112xf32> to vector<112xf32>
    %17 = vector.shape_cast %16 : vector<112xf32> to vector<1x112xf32>
    %cst_12 = arith.constant 0.0714285746 : f32
    %18 = vector.broadcast %cst_12 : f32 to vector<1x112xf32>
    %19 = arith.mulf %17, %18 : vector<1x112xf32>
    %20 = vector.broadcast %19 : vector<1x112xf32> to vector<14x112xf32>
    %21 = arith.subf %15, %20 : vector<14x112xf32>
    %22 = arith.mulf %21, %21 : vector<14x112xf32>
    %cst_13 = arith.constant dense<0.000000e+00> : vector<112xf32>
    %23 = vector.multi_reduction <add>, %22, %cst_13 [0] : vector<14x112xf32> to vector<112xf32>
    %24 = vector.shape_cast %23 : vector<112xf32> to vector<1x112xf32>
    %25 = tpu.concatenate %17, %24 in 0 : vector<1x112xf32>, vector<1x112xf32> -> vector<2x112xf32>
    %c0_14 = arith.constant 0 : index
    %c0_15 = arith.constant 0 : index
    %c0_16 = arith.constant 0 : index
    %26 = vector.load %arg4[%c0_14, %c0_15, %c0_16] : memref<1x2x112xf32, #tpu.memory_space<vmem>>, vector<1x2x112xf32>
    %27 = vector.shape_cast %26 : vector<1x2x112xf32> to vector<2x112xf32>
    %28 = vector.shape_cast %25 : vector<2x112xf32> to vector<1x2x112xf32>
    tpu.vector_store %arg4[%c0_14, %c0_15, %c0_16], %28 {strides = array<i32>} : memref<1x2x112xf32, #tpu.memory_space<vmem>>, vector<1x2x112xf32>,
    %29 = arith.truncf %15 : vector<14x112xf32> to vector<14x112xbf16>
    %c0_17 = arith.constant 0 : index
    %c0_18 = arith.constant 0 : index
    %c0_19 = arith.constant 0 : index
    %30 = vector.load %arg3[%c0_17, %c0_18, %c0_19] : memref<1x14x112xbf16, #tpu.memory_space<vmem>>, vector<1x14x112xbf16>
    %31 = vector.shape_cast %30 : vector<1x14x112xbf16> to vector<14x112xbf16>
    %32 = vector.shape_cast %29 : vector<14x112xbf16> to vector<1x14x112xbf16>
    tpu.vector_store %arg3[%c0_17, %c0_18, %c0_19], %32 {strides = array<i32>} : memref<1x14x112xbf16, #tpu.memory_space<vmem>>, vector<1x14x112xbf16>,
    return
  }
  func.func @transform_0(%arg0: i32) -> (i32, i32, i32) {
    %c0_i32 = arith.constant 0 : i32
    %c0_i32_0 = arith.constant 0 : i32
    %c0_i32_1 = arith.constant 0 : i32
    return %arg0, %c0_i32, %c0_i32_0 : i32, i32, i32
  }
  func.func @transform_1(%arg0: i32) -> (i32, i32, i32) {
    %c0_i32 = arith.constant 0 : i32
    %c0_i32_0 = arith.constant 0 : i32
    %c0_i32_1 = arith.constant 0 : i32
    %c0_i32_2 = arith.constant 0 : i32
    return %c0_i32, %c0_i32_0, %c0_i32_1 : i32, i32, i32
  }
  func.func @transform_2(%arg0: i32) -> (i32, i32, i32) {
    %c0_i32 = arith.constant 0 : i32
    %c0_i32_0 = arith.constant 0 : i32
    %c0_i32_1 = arith.constant 0 : i32
    return %arg0, %c0_i32, %c0_i32_0 : i32, i32, i32
  }
  func.func @transform_3(%arg0: i32) -> (i32, i32, i32) {
    %c0_i32 = arith.constant 0 : i32
    %c0_i32_0 = arith.constant 0 : i32
    %c0_i32_1 = arith.constant 0 : i32
    return %arg0, %c0_i32, %c0_i32_0 : i32, i32, i32
  }
}

module attributes {stable_mosaic.version = 11 : i64} {
  func.func @kernel(%arg0: i32, %arg1: memref<1x14x112xbf16, #tpu.memory_space<vmem>>, %arg2: memref<2x112xf32, #tpu.memory_space<vmem>>, %arg3: memref<3x112x96xbf16, #tpu.memory_space<vmem>>, %arg4: memref<1x12x96xf32, #tpu.memory_space<vmem>>, %arg5: memref<1x2x96xf32, #tpu.memory_space<vmem>>) attributes {dimension_semantics = [#tpu.dimension_semantics<parallel>], iteration_bounds = array<i64: 2>, scalar_prefetch = 0 : i64, scratch_operands = 0 : i64, tpu.core_type = #tpu.core_type<tc>, window_params = [{transform_indices = @transform_0, window_bounds = array<i64: 1, 14, 112>}, {pipeline_mode = #tpu.pipeline_mode<synchronous>, transform_indices = @transform_1, window_bounds = array<i64: 2, 112>}, {pipeline_mode = #tpu.pipeline_mode<synchronous>, transform_indices = @transform_2, window_bounds = array<i64: 3, 112, 96>}, {transform_indices = @transform_3, window_bounds = array<i64: 1, 12, 96>}, {transform_indices = @transform_4, window_bounds = array<i64: 1, 2, 96>}]} {
    %c0 = arith.constant 0 : index
    %c0_0 = arith.constant 0 : index
    %c0_1 = arith.constant 0 : index
    %0 = vector.load %arg1[%c0, %c0_0, %c0_1] : memref<1x14x112xbf16, #tpu.memory_space<vmem>>, vector<1x14x112xbf16>
    %1 = vector.shape_cast %0 : vector<1x14x112xbf16> to vector<14x112xbf16>
    %2 = arith.extf %1 : vector<14x112xbf16> to vector<14x112xf32>
    %c0_2 = arith.constant 0 : index
    %c0_3 = arith.constant 0 : index
    %3 = vector.load %arg2[%c0_2, %c0_3] : memref<2x112xf32, #tpu.memory_space<vmem>>, vector<1x112xf32>
    %4 = vector.broadcast %3 : vector<1x112xf32> to vector<14x112xf32>
    %5 = arith.mulf %2, %4 : vector<14x112xf32>
    %c1 = arith.constant 1 : index
    %c0_4 = arith.constant 0 : index
    %6 = vector.load %arg2[%c1, %c0_4] : memref<2x112xf32, #tpu.memory_space<vmem>>, vector<1x112xf32>
    %7 = vector.broadcast %6 : vector<1x112xf32> to vector<14x112xf32>
    %8 = arith.addf %5, %7 : vector<14x112xf32>
    %cst = arith.constant 0.000000e+00 : f32
    %9 = vector.broadcast %cst : f32 to vector<14x112xf32>
    %10 = arith.maximumf %8, %9 : vector<14x112xf32>
    %11 = arith.truncf %10 : vector<14x112xf32> to vector<14x112xbf16>
    %12 = vector.extract_strided_slice %11 {offsets = [0, 0], sizes = [12, 112], strides = [1, 1]} : vector<14x112xbf16> to vector<12x112xbf16>
    %c0_5 = arith.constant 0 : index
    %c0_6 = arith.constant 0 : index
    %c0_7 = arith.constant 0 : index
    %13 = vector.load %arg3[%c0_5, %c0_6, %c0_7] : memref<3x112x96xbf16, #tpu.memory_space<vmem>>, vector<1x112x96xbf16>
    %14 = vector.shape_cast %13 : vector<1x112x96xbf16> to vector<112x96xbf16>
    %cst_8 = arith.constant dense<0.000000e+00> : vector<12x96xf32>
    %15 = tpu.matmul %12, %14, %cst_8 {dimension_numbers = #tpu.dot_dimension_numbers<[1], [0], [0], [1], [0, 0, 1, 1], [], []>} : vector<12x112xbf16>, vector<112x96xbf16>, vector<12x96xf32> -> vector<12x96xf32>
    %16 = vector.extract_strided_slice %11 {offsets = [1, 0], sizes = [12, 112], strides = [1, 1]} : vector<14x112xbf16> to vector<12x112xbf16>
    %c1_9 = arith.constant 1 : index
    %c0_10 = arith.constant 0 : index
    %c0_11 = arith.constant 0 : index
    %17 = vector.load %arg3[%c1_9, %c0_10, %c0_11] : memref<3x112x96xbf16, #tpu.memory_space<vmem>>, vector<1x112x96xbf16>
    %18 = vector.shape_cast %17 : vector<1x112x96xbf16> to vector<112x96xbf16>
    %cst_12 = arith.constant dense<0.000000e+00> : vector<12x96xf32>
    %19 = tpu.matmul %16, %18, %cst_12 {dimension_numbers = #tpu.dot_dimension_numbers<[1], [0], [0], [1], [0, 0, 1, 1], [], []>} : vector<12x112xbf16>, vector<112x96xbf16>, vector<12x96xf32> -> vector<12x96xf32>
    %20 = arith.addf %15, %19 : vector<12x96xf32>
    %21 = vector.extract_strided_slice %11 {offsets = [2, 0], sizes = [12, 112], strides = [1, 1]} : vector<14x112xbf16> to vector<12x112xbf16>
    %c2 = arith.constant 2 : index
    %c0_13 = arith.constant 0 : index
    %c0_14 = arith.constant 0 : index
    %22 = vector.load %arg3[%c2, %c0_13, %c0_14] : memref<3x112x96xbf16, #tpu.memory_space<vmem>>, vector<1x112x96xbf16>
    %23 = vector.shape_cast %22 : vector<1x112x96xbf16> to vector<112x96xbf16>
    %cst_15 = arith.constant dense<0.000000e+00> : vector<12x96xf32>
    %24 = tpu.matmul %21, %23, %cst_15 {dimension_numbers = #tpu.dot_dimension_numbers<[1], [0], [0], [1], [0, 0, 1, 1], [], []>} : vector<12x112xbf16>, vector<112x96xbf16>, vector<12x96xf32> -> vector<12x96xf32>
    %25 = arith.addf %20, %24 : vector<12x96xf32>
    %cst_16 = arith.constant dense<0.000000e+00> : vector<96xf32>
    %26 = vector.multi_reduction <add>, %25, %cst_16 [0] : vector<12x96xf32> to vector<96xf32>
    %27 = vector.shape_cast %26 : vector<96xf32> to vector<1x96xf32>
    %cst_17 = arith.constant 0.0833333358 : f32
    %28 = vector.broadcast %cst_17 : f32 to vector<1x96xf32>
    %29 = arith.mulf %27, %28 : vector<1x96xf32>
    %30 = vector.broadcast %29 : vector<1x96xf32> to vector<12x96xf32>
    %31 = arith.subf %25, %30 : vector<12x96xf32>
    %32 = arith.mulf %31, %31 : vector<12x96xf32>
    %cst_18 = arith.constant dense<0.000000e+00> : vector<96xf32>
    %33 = vector.multi_reduction <add>, %32, %cst_18 [0] : vector<12x96xf32> to vector<96xf32>
    %34 = vector.shape_cast %33 : vector<96xf32> to vector<1x96xf32>
    %35 = tpu.concatenate %27, %34 in 0 : vector<1x96xf32>, vector<1x96xf32> -> vector<2x96xf32>
    %c0_19 = arith.constant 0 : index
    %c0_20 = arith.constant 0 : index
    %c0_21 = arith.constant 0 : index
    %36 = vector.load %arg5[%c0_19, %c0_20, %c0_21] : memref<1x2x96xf32, #tpu.memory_space<vmem>>, vector<1x2x96xf32>
    %37 = vector.shape_cast %36 : vector<1x2x96xf32> to vector<2x96xf32>
    %38 = vector.shape_cast %35 : vector<2x96xf32> to vector<1x2x96xf32>
    tpu.vector_store %arg5[%c0_19, %c0_20, %c0_21], %38 {strides = array<i32>} : memref<1x2x96xf32, #tpu.memory_space<vmem>>, vector<1x2x96xf32>,
    %c0_22 = arith.constant 0 : index
    %c0_23 = arith.constant 0 : index
    %c0_24 = arith.constant 0 : index
    %39 = vector.load %arg4[%c0_22, %c0_23, %c0_24] : memref<1x12x96xf32, #tpu.memory_space<vmem>>, vector<1x12x96xf32>
    %40 = vector.shape_cast %39 : vector<1x12x96xf32> to vector<12x96xf32>
    %41 = vector.shape_cast %25 : vector<12x96xf32> to vector<1x12x96xf32>
    tpu.vector_store %arg4[%c0_22, %c0_23, %c0_24], %41 {strides = array<i32>} : memref<1x12x96xf32, #tpu.memory_space<vmem>>, vector<1x12x96xf32>,
    return
  }
  func.func @transform_0(%arg0: i32) -> (i32, i32, i32) {
    %c0_i32 = arith.constant 0 : i32
    %c0_i32_0 = arith.constant 0 : i32
    %c0_i32_1 = arith.constant 0 : i32
    return %arg0, %c0_i32, %c0_i32_0 : i32, i32, i32
  }
  func.func @transform_1(%arg0: i32) -> (i32, i32) {
    %c0_i32 = arith.constant 0 : i32
    %c0_i32_0 = arith.constant 0 : i32
    %c0_i32_1 = arith.constant 0 : i32
    return %c0_i32, %c0_i32_0 : i32, i32
  }
  func.func @transform_2(%arg0: i32) -> (i32, i32, i32) {
    %c0_i32 = arith.constant 0 : i32
    %c0_i32_0 = arith.constant 0 : i32
    %c0_i32_1 = arith.constant 0 : i32
    %c0_i32_2 = arith.constant 0 : i32
    return %c0_i32, %c0_i32_0, %c0_i32_1 : i32, i32, i32
  }
  func.func @transform_3(%arg0: i32) -> (i32, i32, i32) {
    %c0_i32 = arith.constant 0 : i32
    %c0_i32_0 = arith.constant 0 : i32
    %c0_i32_1 = arith.constant 0 : i32
    return %arg0, %c0_i32, %c0_i32_0 : i32, i32, i32
  }
  func.func @transform_4(%arg0: i32) -> (i32, i32, i32) {
    %c0_i32 = arith.constant 0 : i32
    %c0_i32_0 = arith.constant 0 : i32
    %c0_i32_1 = arith.constant 0 : i32
    return %arg0, %c0_i32, %c0_i32_0 : i32, i32, i32
  }
}

module attributes {stable_mosaic.version = 11 : i64} {
  func.func @_bn_relu_kernel(%arg0: i32, %arg1: memref<24x96xf32, #tpu.memory_space<vmem>>, %arg2: memref<2x96xf32, #tpu.memory_space<vmem>>, %arg3: memref<24x96xf32, #tpu.memory_space<vmem>>) attributes {dimension_semantics = [#tpu.dimension_semantics<parallel>], iteration_bounds = array<i64: 1>, scalar_prefetch = 0 : i64, scratch_operands = 0 : i64, tpu.core_type = #tpu.core_type<tc>, window_params = [{transform_indices = @transform_0, window_bounds = array<i64: 24, 96>}, {pipeline_mode = #tpu.pipeline_mode<synchronous>, transform_indices = @transform_1, window_bounds = array<i64: 2, 96>}, {transform_indices = @transform_2, window_bounds = array<i64: 24, 96>}]} {
    %c0 = arith.constant 0 : index
    %c0_0 = arith.constant 0 : index
    %0 = vector.load %arg1[%c0, %c0_0] : memref<24x96xf32, #tpu.memory_space<vmem>>, vector<24x96xf32>
    %c0_1 = arith.constant 0 : index
    %c0_2 = arith.constant 0 : index
    %1 = vector.load %arg2[%c0_1, %c0_2] : memref<2x96xf32, #tpu.memory_space<vmem>>, vector<1x96xf32>
    %2 = vector.broadcast %1 : vector<1x96xf32> to vector<24x96xf32>
    %3 = arith.mulf %0, %2 : vector<24x96xf32>
    %c1 = arith.constant 1 : index
    %c0_3 = arith.constant 0 : index
    %4 = vector.load %arg2[%c1, %c0_3] : memref<2x96xf32, #tpu.memory_space<vmem>>, vector<1x96xf32>
    %5 = vector.broadcast %4 : vector<1x96xf32> to vector<24x96xf32>
    %6 = arith.addf %3, %5 : vector<24x96xf32>
    %cst = arith.constant 0.000000e+00 : f32
    %7 = vector.broadcast %cst : f32 to vector<24x96xf32>
    %8 = arith.maximumf %6, %7 : vector<24x96xf32>
    %c0_4 = arith.constant 0 : index
    %c0_5 = arith.constant 0 : index
    %9 = vector.load %arg3[%c0_4, %c0_5] : memref<24x96xf32, #tpu.memory_space<vmem>>, vector<24x96xf32>
    tpu.vector_store %arg3[%c0_4, %c0_5], %8 {strides = array<i32>} : memref<24x96xf32, #tpu.memory_space<vmem>>, vector<24x96xf32>,
    return
  }
  func.func @transform_0(%arg0: i32) -> (i32, i32) {
    %c0_i32 = arith.constant 0 : i32
    %c0_i32_0 = arith.constant 0 : i32
    return %arg0, %c0_i32 : i32, i32
  }
  func.func @transform_1(%arg0: i32) -> (i32, i32) {
    %c0_i32 = arith.constant 0 : i32
    %c0_i32_0 = arith.constant 0 : i32
    %c0_i32_1 = arith.constant 0 : i32
    return %c0_i32, %c0_i32_0 : i32, i32
  }
  func.func @transform_2(%arg0: i32) -> (i32, i32) {
    %c0_i32 = arith.constant 0 : i32
    %c0_i32_0 = arith.constant 0 : i32
    return %arg0, %c0_i32 : i32, i32
  }
}

</mosaic_0001>

<bundles_post_ra>
// kernel: double_conv2d_nhwc.3
= control target key start
LH: loop header
LB: loop body
LE: loop exit
PB: predicated region body
PF: predicated region fallthrough
CT: control target
= control target key end

     0   :  { %s711_s12 = smov 0   ;;  %s785_s0 = inlined_call_operand.vmem [shape: bf16[2,16,64], index: 0, kind: input, shape index: {}]   ;;  %s786_s1 = inlined_call_operand.vmem [shape: bf16[3,64,112], index: 1, kind: input, shape index: {}]   ;;  %s787_s2 = inlined_call_operand.vmem [shape: bf16[2,14,112], index: 2, kind: output, shape index: {0}]   ;;  %s788_s3 = inlined_call_operand.vmem [shape: f32[2,2,112], index: 3, kind: output, shape index: {1}]  }
   0x1 LB: > { %s557_s13 = sadd.s32 4294967295, %s687_s12   ;;  %p561_p0 = scmp.ge.s32.totalorder %s687_s12, 1  ;;  %s687_s12 = sphi %s711_s12, %s14_s12  }
   0x2   : > { %p140_p1 = scmp.lt.s32.totalorder %s687_s12, 3 }
   0x4   : > { %p141_p2 = pnand %p561_p0, %p140_p1 }
   0x5   : > { %p168_p3 = scmp.lt.s32.totalorder (!%p141_p2), %s557_s13, 1 }
   0x6   : > { %144 = sbr.rel (%p141_p2) target bundleno = 281 (0x119), region = 28 }
   0xb   : > { %v668_v0 = vld [vmem:[%s786_s1 + $0x38] sm:$0xff]   ;;  %v689_v1 = vmov 0.0   ;;  %v670_v3 = vld [vmem:[%s786_s1 + $0x30] sm:$0xff]   ;;  %vm690_vm0 = vmmov 0   ;;  %s790_s13 = smov (!%p168_p3, %s557_s13), 1  ;;  %v672_v5 = vld [vmem:[%s786_s1 + $0x28] sm:$0xff]  }
   0xc   : > { %622 = vmatprep.subr.bf16.mxu0 %v689_v1  ;;  %634 = vmatprep.subr.bf16.mxu1 %v689_v1  ;;  %v669_v2 = vld [vmem:[%s786_s1 + $0x18] sm:$0xff]   ;;  %v671_v4 = vld [vmem:[%s786_s1 + $0x10] sm:$0xff]   ;;  %s603_s24 = sshll.u32 %s790_s13, 3  ;;  %v673_v6 = vld [vmem:[%s786_s1 + $0x8] sm:$0xff]   ;;  %vm238_vm1 = vcmask 523264   ;;  %vm467_vm2 = vcmask 912384  }
   0xd   : > { %623 = vmatpush3.bf16.msra.mxu0 %v668_v0  ;;  %630 = vmatprep.mubr.msk.bf16.mxu0 %vm690_vm0, %v689_v1  ;;  %s172_s29 = scalar_lea.vmem %s785_s0, %s603_s24  ;;  %v674_v8 = vld [vmem:[%s786_s1 + $0x20] sm:$0xff]   ;;  %v677_v14 = vld [vmem:[%s786_s1 + $0x58] sm:$0xff]   ;;  %v678_v15 = vld [vmem:[%s786_s1 + $0x50] sm:$0xff]   ;;  %s177_s19 = scalar_lea.vmem %s787_s2, %s603_s24  ;;  %vm430_vm3 = vcmask 916480   ;;  %vm432_vm4 = vcmask 914432   ;;  %vm469_vm5 = vcmask 911360  }
   0xe   : > { %635 = vmatpush3.bf16.msra.mxu1 %v669_v2  ;;  %624 = vmatprep.subr.bf16.mxu0 %v689_v1  ;;  %v676_v7 = vld [vmem:[%s172_s29] sm:$0xff]   ;;  %v679_v16 = vld [vmem:[%s786_s1 + $0x48] sm:$0xff]   ;;  %s566_s20 = sshll.u32 %s790_s13, 1  ;;  %vm455_vm6 = vcmask 1040384   ;;  %vm457_vm7 = vcmask 910336  }
   0xf   : > { %636 = vmatprep.subr.bf16.mxu1 %v689_v1  ;;  %642 = vmatprep.mubr.msk.bf16.mxu1 %vm690_vm0, %v689_v1  ;;  %v208_v9 = vshrl.u32 %v676_v7, 16  ;;  %v210_v10 = vshll.u32 %v676_v7, 16  ;;  %v675_v11 = vld [vmem:[%s786_s1] sm:$0xff]   ;;  %v359_v18 = vrot.slane %v676_v7, 1  ;;  %s181_s23 = scalar_lea.vmem %s788_s3, %s566_s20 }
  0x10   : > { %v680_v17 = vld [vmem:[%s786_s1 + $0x40] sm:$0xff]  }
  0x11   : > { %625 = vmatpush3.bf16.msra.mxu0 %v670_v3  ;;  %v212_v12 = vrot.slane %v210_v10, 1 }
  0x12   : > { %637 = vmatpush3.bf16.msra.mxu1 %v671_v4  ;;  %626 = vmatprep.subr.bf16.mxu0 %v689_v1 }
  0x13   : > { %638 = vmatprep.subr.bf16.mxu1 %v689_v1  ;;  %v213_v13 = vor.u32 %v212_v12, %v208_v9 }
  0x15   : > { %627 = vmatpush3.bf16.msra.mxu0 %v672_v5 }
  0x16   : > { %639 = vmatpush3.bf16.msra.mxu1 %v673_v6  ;;  %628 = vmatprep.subr.bf16.mxu0 %v689_v1 }
  0x17   : > { %640 = vmatprep.subr.bf16.mxu1 %v689_v1 }
  0x19   : > { %629 = vmatpush3.bf16.msra.mxu0 %v674_v8 }
  0x1a   : > { %641 = vmatpush3.bf16.msra.mxu1 %v675_v11  ;;  %646 = vmatprep.subr.bf16.mxu0 %v689_v1 }
  0x1c   : > { %631 = vmatmul.mubr.msk.bf16.vlgmr.msra.gmra.mxu0 %vm238_vm1, %v213_v13 }
  0x1d   : > { %643 = vmatmul.mubr.msk.bf16.vlgmr.msra.gmra.mxu1 %vm238_vm1, %v676_v7  ;;  %647 = vmatpush3.bf16.msra.mxu0 %v677_v14 }
  0x1e   : > { %648 = vmatprep.subr.bf16.mxu0 %v689_v1  ;;  %654 = vmatprep.mubr.msk.bf16.mxu0 %vm690_vm0, %v689_v1 }
  0x21   : > { %649 = vmatpush3.bf16.msra.mxu0 %v678_v15 }
  0x22   : > { %650 = vmatprep.subr.bf16.mxu0 %v689_v1 }
  0x25   : > { %651 = vmatpush3.bf16.msra.mxu0 %v679_v16 }
  0x26   : > { %652 = vmatprep.subr.bf16.mxu0 %v689_v1 }
  0x29   : > { %653 = vmatpush3.bf16.msra.mxu0 %v680_v17 }
  0x2c   : > { %655 = vmatmul.mubr.msk.bf16.vlgmr.msra.gmra.mxu0 %vm238_vm1, %v359_v18 }
  0xdc   : > { %v276_v19 = vpop.f32.mrf.mxu0 }
  0xdd   : > { %v343_v20 = vpop.f32.mrf.mxu1 }
  0xde   : > { %v632_v21 = vpop.f32.mrf.mxu0  ;;  %v344_v27 = vadd.f32 %v343_v20, %v276_v19 }
  0xdf   : > { %v644_v22 = vpop.f32.mrf.mxu1 }
  0xe0   : > { %v279_v23 = vpop.f32.mrf.mxu0 }
  0xe1   : > { %v346_v24 = vpop.f32.mrf.mxu1 }
  0xe2   : > { %v633_v25 = vpop.f32.mrf.mxu0  ;;  %v347_v31 = vadd.f32 %v346_v24, %v279_v23 }
  0xe3   : > { %v645_v26 = vpop.f32.mrf.mxu1 }
  0xec   : > { %v421_v28 = vpop.f32.mrf.mxu0 }
  0xed   : > { %v428_v29 = vadd.f32 %v421_v28, %v344_v27 }
  0xee   : > { %v656_v30 = vpop.f32.mrf.mxu0 }
  0xef   : > { %v605_v32 = vpack.c.bf16 %v428_v29, %v428_v29  ;;  %v431_v36 = vsel %vm430_vm3, %v428_v29, 0.0 }
  0xf0   : > { %v424_v33 = vpop.f32.mrf.mxu0 }
  0xf1   : > { %468 = vst.msk [vmem:[%s177_s19] sm:$0xf] %vm467_vm2, %v605_v32  ;;  %v429_v34 = vadd.f32 %v424_v33, %v347_v31 }
  0xf2   : > { %v657_v35 = vpop.f32.mrf.mxu0 }
  0xf3   : > { %v433_v37 = vsel %vm432_vm4, %v429_v34, 0.0  ;;  %v606_v38 = vpack.c.bf16 %v429_v34, %v429_v34 }
  0xf4   : > { %v434_v39 = vadd.f32 %v433_v37, %v431_v36 }
  0xf5   : > { %470 = vst.msk [vmem:[%s177_s19 + $0x4] sm:$0x7] %vm469_vm5, %v606_v38 }
  0xf6   : > { %v435_v40 = vrot.slane %v434_v39, 4 }
  0xf8   : > { %v436_v41 = vadd.f32 %v435_v40, %v434_v39 }
  0xfa   : > { %v437_v42 = vrot.slane %v436_v41, 2 }
  0xfc   : > { %v438_v43 = vadd.f32 %v437_v42, %v436_v41 }
  0xfe   : > { %v439_v44 = vrot.slane %v438_v43, 1 }
 0x100   : > { %v440_v45 = vadd.f32 %v439_v44, %v438_v43 }
 0x102   : > { %v441_v46 = vmul.f32 0.071428575, %v440_v45 }
 0x104   : > { %v442_v47 = vsub.f32 %v428_v29, %v441_v46  ;;  %v443_v48 = vsub.f32 %v429_v34, %v441_v46 }
 0x106   : > { %v444_v49 = vmul.f32 %v442_v47, %v442_v47  ;;  %v445_v50 = vmul.f32 %v443_v48, %v443_v48 }
 0x108   : > { %v446_v51 = vsel %vm430_vm3, %v444_v49, 0.0  ;;  %v447_v52 = vsel %vm432_vm4, %v445_v50, 0.0 }
 0x109   : > { %v448_v53 = vadd.f32 %v447_v52, %v446_v51 }
 0x10b   : > { %v449_v54 = vrot.slane %v448_v53, 4 }
 0x10d   : > { %v450_v55 = vadd.f32 %v449_v54, %v448_v53 }
 0x10f   : > { %v451_v56 = vrot.slane %v450_v55, 2 }
 0x111   : > { %v452_v57 = vadd.f32 %v451_v56, %v450_v55 }
 0x113   : > { %v453_v58 = vrot.slane %v452_v57, 1 }
 0x115   : > { %v454_v59 = vadd.f32 %v453_v58, %v452_v57 }
 0x117   : > { %v456_v60 = vsel %vm455_vm6, %v440_v45, %v454_v59 }
 0x118   : > { %458 = vst.msk [vmem:[%s181_s23] sm:$0x3] %vm457_vm7, %v456_v60 }
 0x119 PF: > { %s14_s12 = sadd.s32 1, %s687_s12  }
 0x11a   : > { %p11_p4 = scmp.ge.s32.totalorder %s14_s12, 4  }
 0x11c   :  { %13 = sbr.rel (!%p11_p4) target bundleno = 1 (0x1), region = 72 }

// kernel: tile.27
= control target key start
LH: loop header
LB: loop body
LE: loop exit
PB: predicated region body
PF: predicated region fallthrough
CT: control target
= control target key end

     0   :  { %s28_s0 = inlined_call_operand.vmem [shape: f32[8], index: 0, kind: input, shape index: {}]   ;;  %s29_s1 = inlined_call_operand.vmem [shape: f32[14,8], index: 1, kind: output, shape index: {}]  }
   0x1   :  { %v4_v0 = vld [vmem:[%s28_s0] ss:$0 sm:$0xff] }
   0x2   :  { %5 = vst [vmem:[%s29_s1] sm:$0xff] %v4_v0  ;;  %8 = vst [vmem:[%s29_s1 + $0x8] sm:$0xff] %v4_v0 }

// kernel: tile.29
= control target key start
LH: loop header
LB: loop body
LE: loop exit
PB: predicated region body
PF: predicated region fallthrough
CT: control target
= control target key end

     0   :  { %s117_s10 = smov 104   ;;  %s118_s11 = smov 88   ;;  %vm3_vm0 = vcmask 64512   ;;  %vm9_vm1 = vcmask 917312   ;;  %vm15_vm2 = vcmask 851712   ;;  %vm21_vm3 = vcmask 786112   ;;  %s185_s0 = inlined_call_operand.vmem [shape: f32[14,8], index: 0, kind: input, shape index: {}]   ;;  %s186_s1 = inlined_call_operand.vmem [shape: f32[1,112], index: 1, kind: output, shape index: {}]  }
   0x1   :  { %v91_v0 = vld [vmem:[%s185_s0 + $0xd] sm:$0x1]   ;;  %v93_v1 = vld [vmem:[%s185_s0 + $0xb] sm:$0x1]   ;;  %v92_v2 = vld [vmem:[%s185_s0 + $0xc] sm:$0x1]  }
   0x2   :  { %7 = vrot.lane.b32.xlu0 %v91_v0, %s117_s10  ;;  %19 = vrot.lane.b32.xlu1 %v93_v1, %s118_s11  ;;  %v94_v3 = vld [vmem:[%s185_s0 + $0xa] sm:$0x1]   ;;  %s119_s16 = smov 96   ;;  %s120_s17 = smov 80   ;;  %v95_v4 = vld [vmem:[%s185_s0 + $0x9] sm:$0x1]  }
   0x3   :  { %v96_v5 = vld [vmem:[%s185_s0 + $0x8] sm:$0x1]   ;;  %v2_v6 = vld [vmem:[%s185_s0] sm:$0x1]   ;;  %s121_s24 = smov 72   ;;  %s122_s25 = smov 64  }
   0x4   :  { %4 = vst.msk [vmem:[#allocation0] sm:$0x1] %vm3_vm0, %v2_v6   ;;  %v97_v7 = vld [vmem:[%s185_s0 + $0x7] sm:$0x1]   ;;  %v98_v8 = vld [vmem:[%s185_s0 + $0x6] sm:$0x1]  }
   0x5   :  { %s123_s30 = smov 56   ;;  %s124_s2 = smov 48   ;;  %v99_v9 = vld [vmem:[%s185_s0 + $0x5] sm:$0x1]   ;;  %v100_v10 = vld [vmem:[%s185_s0 + $0x4] sm:$0x1]  }
   0x6   :  { %13 = vrot.lane.b32.xlu0 %v92_v2, %s119_s16  ;;  %25 = vrot.lane.b32.xlu1 %v94_v3, %s120_s17  ;;  %s125_s7 = smov 40   ;;  %s126_s8 = smov 32   ;;  %v101_v11 = vld [vmem:[%s185_s0 + $0x3] sm:$0x1]   ;;  %v102_v12 = vld [vmem:[%s185_s0 + $0x2] sm:$0x1]  }
   0x7   :  { %s127_s13 = smov 24   ;;  %s128_s14 = smov 16   ;;  %v103_v13 = vld [vmem:[%s185_s0 + $0x1] sm:$0x1]   ;;  %vm27_vm4 = vcmask 720512   ;;  %vm33_vm5 = vcmask 654912  }
   0x8   :  { %s129_s0 = smov 8   ;;  %vm39_vm6 = vcmask 589312   ;;  %vm45_vm7 = vcmask 523712   ;;  %vm51_vm8 = vcmask 458112   ;;  %vm57_vm9 = vcmask 392512  }
   0x9   :  { %vm63_vm10 = vcmask 326912   ;;  %vm69_vm11 = vcmask 261312   ;;  %vm75_vm12 = vcmask 195712   ;;  %vm81_vm13 = vcmask 130112  }
   0xa   :  { %31 = vrot.lane.b32.xlu0 %v95_v4, %s121_s24  ;;  %37 = vrot.lane.b32.xlu1 %v96_v5, %s122_s25 }
   0xe   :  { %43 = vrot.lane.b32.xlu0 %v97_v7, %s123_s30  ;;  %49 = vrot.lane.b32.xlu1 %v98_v8, %s124_s2 }
  0x12   :  { %55 = vrot.lane.b32.xlu0 %v99_v9, %s125_s7  ;;  %61 = vrot.lane.b32.xlu1 %v100_v10, %s126_s8 }
  0x16   :  { %67 = vrot.lane.b32.xlu0 %v101_v11, %s127_s13  ;;  %73 = vrot.lane.b32.xlu1 %v102_v12, %s128_s14 }
  0x1a   :  { %79 = vrot.lane.b32.xlu0 %v103_v13, %s129_s0 }
  0x74   :  { %v8_v14 = vpop.permute.xlu0 %7   ;;  %v20_v15 = vpop.permute.xlu1 %19  }
  0x75   :  { %10 = vst.msk [vmem:[#allocation0] sm:$0x1] %vm9_vm1, %v8_v14  }
  0x78   :  { %v14_v16 = vpop.permute.xlu0 %13   ;;  %v26_v17 = vpop.permute.xlu1 %25  }
  0x79   :  { %16 = vst.msk [vmem:[#allocation0] sm:$0x1] %vm15_vm2, %v14_v16  }
  0x7a   :  { %22 = vst.msk [vmem:[#allocation0] sm:$0x1] %vm21_vm3, %v20_v15  }
  0x7b   :  { %28 = vst.msk [vmem:[#allocation0] sm:$0x1] %vm27_vm4, %v26_v17  }
  0x7c   :  { %v32_v18 = vpop.permute.xlu0 %31   ;;  %v38_v19 = vpop.permute.xlu1 %37  }
  0x7d   :  { %34 = vst.msk [vmem:[#allocation0] sm:$0x1] %vm33_vm5, %v32_v18  }
  0x7e   :  { %40 = vst.msk [vmem:[#allocation0] sm:$0x1] %vm39_vm6, %v38_v19  }
  0x80   :  { %v44_v20 = vpop.permute.xlu0 %43   ;;  %v50_v21 = vpop.permute.xlu1 %49  }
  0x81   :  { %46 = vst.msk [vmem:[#allocation0] sm:$0x1] %vm45_vm7, %v44_v20  }
  0x82   :  { %52 = vst.msk [vmem:[#allocation0] sm:$0x1] %vm51_vm8, %v50_v21  }
  0x84   :  { %v56_v22 = vpop.permute.xlu0 %55   ;;  %v62_v23 = vpop.permute.xlu1 %61  }
  0x85   :  { %58 = vst.msk [vmem:[#allocation0] sm:$0x1] %vm57_vm9, %v56_v22  }
  0x86   :  { %64 = vst.msk [vmem:[#allocation0] sm:$0x1] %vm63_vm10, %v62_v23  }
  0x88   :  { %v68_v24 = vpop.permute.xlu0 %67   ;;  %v74_v25 = vpop.permute.xlu1 %73  }
  0x89   :  { %70 = vst.msk [vmem:[#allocation0] sm:$0x1] %vm69_vm11, %v68_v24  }
  0x8a   :  { %76 = vst.msk [vmem:[#allocation0] sm:$0x1] %vm75_vm12, %v74_v25  }
  0x8c   :  { %v80_v26 = vpop.permute.xlu0 %79  }
  0x8d   :  { %82 = vst.msk [vmem:[#allocation0] sm:$0x1] %vm81_vm13, %v80_v26  }
  0x94   :  { %v87_v27 = vld [vmem:[#allocation0] sm:$0x1] }
  0x95   :  { %90 = vst [vmem:[%s186_s1] sm:$0x1] %v87_v27 }

// kernel: tile.37
= control target key start
LH: loop header
LB: loop body
LE: loop exit
PB: predicated region body
PF: predicated region fallthrough
CT: control target
= control target key end

     0   :  { %s28_s0 = inlined_call_operand.vmem [shape: f32[8], index: 0, kind: input, shape index: {}]   ;;  %s29_s1 = inlined_call_operand.vmem [shape: f32[12,8], index: 1, kind: output, shape index: {}]  }
   0x1   :  { %v4_v0 = vld [vmem:[%s28_s0] ss:$0 sm:$0xff] }
   0x2   :  { %5 = vst [vmem:[%s29_s1] sm:$0xff] %v4_v0  ;;  %8 = vst [vmem:[%s29_s1 + $0x8] sm:$0xff] %v4_v0 }

// kernel: double_conv2d_nhwc.4
= control target key start
LH: loop header
LB: loop body
LE: loop exit
PB: predicated region body
PF: predicated region fallthrough
CT: control target
= control target key end

     0   :  { %s873_s15 = smov 0   ;;  %s1003_s0 = inlined_call_operand.vmem [shape: bf16[2,14,112], index: 0, kind: input, shape index: {}]   ;;  %s1004_s1 = inlined_call_operand.vmem [shape: f32[2,112], index: 1, kind: input, shape index: {}]   ;;  %s1005_s2 = inlined_call_operand.vmem [shape: bf16[3,112,96], index: 2, kind: input, shape index: {}]   ;;  %s1006_s3 = inlined_call_operand.vmem [shape: f32[2,12,96], index: 3, kind: output, shape index: {0}]   ;;  %s1007_s4 = inlined_call_operand.vmem [shape: f32[2,2,96], index: 4, kind: output, shape index: {1}]  }
   0x1 LB: > { %s661_s16 = sadd.s32 4294967295, %s844_s15   ;;  %p665_p0 = scmp.ge.s32.totalorder %s844_s15, 1  ;;  %s844_s15 = sphi %s873_s15, %s15_s15  }
   0x2   : > { %p165_p1 = scmp.lt.s32.totalorder %s844_s15, 3 }
   0x4   : > { %p166_p2 = pnand %p665_p0, %p165_p1 }
   0x5   : > { %p195_p3 = scmp.lt.s32.totalorder (!%p166_p2), %s661_s16, 1 }
   0x6   : > { %169 = sbr.rel (%p166_p2) target bundleno = 305 (0x131), region = 32 }
   0xb   : > { %v817_v0 = vld [vmem:[%s1005_s2 + $0x68] sm:$0xff]   ;;  %v846_v1 = vmov 0.0   ;;  %v818_v2 = vld [vmem:[%s1005_s2 + $0x30] sm:$0xff]   ;;  %v819_v3 = vld [vmem:[%s1005_s2 + $0x60] sm:$0xff]   ;;  %vm847_vm0 = vmmov 0   ;;  %s1009_s16 = smov (!%p195_p3, %s661_s16), 1 }
   0xc   : > { %753 = vmatprep.subr.bf16.mxu0 %v846_v1  ;;  %771 = vmatprep.subr.bf16.mxu1 %v846_v1  ;;  %v820_v4 = vld [vmem:[%s1005_s2 + $0x28] sm:$0xff]   ;;  %v821_v5 = vld [vmem:[%s1005_s2 + $0x58] sm:$0xff]   ;;  %v822_v6 = vld [vmem:[%s1005_s2 + $0x20] sm:$0xff]   ;;  %s727_s29 = sshll.u32 %s1009_s16, 3  ;;  %vm309_vm1 = vcmask 916480   ;;  %s728_s19 = sshll.u32 %s1009_s16, 4 }
   0xd   : > { %754 = vmatpush3.bf16.msra.mxu0 %v817_v0  ;;  %767 = vmatprep.mubr.msk.bf16.mxu0 %vm847_vm0, %v846_v1  ;;  %v823_v7 = vld [vmem:[%s1005_s2 + $0x50] sm:$0xff]   ;;  %v824_v8 = vld [vmem:[%s1005_s2 + $0x18] sm:$0xff]   ;;  %s199_s10 = scalar_lea.vmem %s1003_s0, %s727_s29  ;;  %v825_v9 = vld [vmem:[%s1005_s2 + $0x48] sm:$0xff]   ;;  %s204_s22 = scalar_lea.vmem %s1006_s3, %s728_s19  ;;  %vm544_vm2 = vcmask 785408   ;;  %vm546_vm3 = vcmask 781312   ;;  %vm569_vm4 = vcmask 1040384  }
   0xe   : > { %772 = vmatpush3.bf16.msra.mxu1 %v818_v2  ;;  %755 = vmatprep.subr.bf16.mxu0 %v846_v1  ;;  %v210_v10 = vld [vmem:[%s199_s10] sm:$0xf]  ;;  %v211_v11 = vld [vmem:[%s199_s10 + $0x4] sm:$0x7]  ;;  %v826_v13 = vld [vmem:[%s1005_s2 + $0x10] sm:$0xff]   ;;  %s670_s23 = sshll.u32 %s1009_s16, 1 }
   0xf   : > { %773 = vmatprep.subr.bf16.mxu1 %v846_v1  ;;  %785 = vmatprep.mubr.msk.bf16.mxu1 %vm847_vm0, %v846_v1  ;;  %v671_v12 = vld [vmem:[%s1004_s1] ss:$0 sm:$0xff]  ;;  %v212_v14 = vunpack.c.l.bf16 %v210_v10  ;;  %v213_v15 = vunpack.c.l.bf16 %v211_v11  ;;  %v672_v16 = vld [vmem:[%s1004_s1 + $0x1] ss:$0 sm:$0xff]  ;;  %v828_v20 = vld [vmem:[%s1005_s2 + $0x8] sm:$0xff]   ;;  %s208_s26 = scalar_lea.vmem %s1007_s4, %s670_s23  ;;  %vm571_vm5 = vcmask 779264  }
  0x10   : > { %v827_v19 = vld [vmem:[%s1005_s2 + $0x40] sm:$0xff]   ;;  %v829_v25 = vld [vmem:[%s1005_s2 + $0x38] sm:$0xff]   ;;  %v833_v34 = vld [vmem:[%s1005_s2 + $0x90] sm:$0xff]  }
  0x11   : > { %756 = vmatpush3.bf16.msra.mxu0 %v819_v3  ;;  %v219_v17 = vmul.f32 %v671_v12, %v212_v14  ;;  %v220_v18 = vmul.f32 %v671_v12, %v213_v15  ;;  %v830_v26 = vld [vmem:[%s1005_s2] sm:$0xff]   ;;  %v832_v33 = vld [vmem:[%s1005_s2 + $0x98] sm:$0xff]   ;;  %v834_v35 = vld [vmem:[%s1005_s2 + $0x88] sm:$0xff]  }
  0x12   : > { %774 = vmatpush3.bf16.msra.mxu1 %v820_v4  ;;  %757 = vmatprep.subr.bf16.mxu0 %v846_v1  ;;  %v831_v31 = vld [vmem:[%s1005_s2 + $0xa0] sm:$0xff]   ;;  %v836_v37 = vld [vmem:[%s1005_s2 + $0x78] sm:$0xff]   ;;  %v837_v38 = vld [vmem:[%s1005_s2 + $0x70] sm:$0xff]  }
  0x13   : > { %775 = vmatprep.subr.bf16.mxu1 %v846_v1  ;;  %v226_v21 = vadd.f32 %v672_v16, %v219_v17  ;;  %v227_v22 = vadd.f32 %v672_v16, %v220_v18  ;;  %v835_v36 = vld [vmem:[%s1005_s2 + $0x80] sm:$0xff]  }
  0x15   : > { %758 = vmatpush3.bf16.msra.mxu0 %v821_v5  ;;  %v228_v23 = vmax.f32 %v226_v21, 0.0  ;;  %v229_v24 = vmax.f32 %v227_v22, 0.0 }
  0x16   : > { %776 = vmatpush3.bf16.msra.mxu1 %v822_v6  ;;  %759 = vmatprep.subr.bf16.mxu0 %v846_v1 }
  0x17   : > { %777 = vmatprep.subr.bf16.mxu1 %v846_v1  ;;  %v230_v27 = vpack.c.bf16 %v229_v24, %v228_v23 }
  0x19   : > { %760 = vmatpush3.bf16.msra.mxu0 %v823_v7  ;;  %v261_v28 = vshrl.u32 %v230_v27, 16  ;;  %v263_v29 = vshll.u32 %v230_v27, 16  ;;  %v455_v39 = vrot.slane %v230_v27, 1 }
  0x1a   : > { %778 = vmatpush3.bf16.msra.mxu1 %v824_v8  ;;  %761 = vmatprep.subr.bf16.mxu0 %v846_v1 }
  0x1b   : > { %779 = vmatprep.subr.bf16.mxu1 %v846_v1  ;;  %v265_v30 = vrot.slane %v263_v29, 1 }
  0x1d   : > { %762 = vmatpush3.bf16.msra.mxu0 %v825_v9  ;;  %v266_v32 = vor.u32 %v265_v30, %v261_v28 }
  0x1e   : > { %780 = vmatpush3.bf16.msra.mxu1 %v826_v13  ;;  %763 = vmatprep.subr.bf16.mxu0 %v846_v1 }
  0x1f   : > { %781 = vmatprep.subr.bf16.mxu1 %v846_v1 }
  0x21   : > { %764 = vmatpush3.bf16.msra.mxu0 %v827_v19 }
  0x22   : > { %782 = vmatpush3.bf16.msra.mxu1 %v828_v20  ;;  %765 = vmatprep.subr.bf16.mxu0 %v846_v1 }
  0x23   : > { %783 = vmatprep.subr.bf16.mxu1 %v846_v1 }
  0x25   : > { %766 = vmatpush3.bf16.msra.mxu0 %v829_v25 }
  0x26   : > { %784 = vmatpush3.bf16.msra.mxu1 %v830_v26  ;;  %789 = vmatprep.subr.bf16.mxu0 %v846_v1 }
  0x28   : > { %768 = vmatmul.mubr.msk.bf16.vlgmr.msra.gmra.mxu0 %vm309_vm1, %v266_v32 }
  0x29   : > { %786 = vmatmul.mubr.msk.bf16.vlgmr.msra.gmra.mxu1 %vm309_vm1, %v230_v27  ;;  %790 = vmatpush3.bf16.msra.mxu0 %v831_v31 }
  0x2a   : > { %803 = vmatprep.mubr.msk.bf16.mxu0 %vm847_vm0, %v846_v1  ;;  %791 = vmatprep.subr.bf16.mxu0 %v846_v1 }
  0x2d   : > { %792 = vmatpush3.bf16.msra.mxu0 %v832_v33 }
  0x2e   : > { %793 = vmatprep.subr.bf16.mxu0 %v846_v1 }
  0x31   : > { %794 = vmatpush3.bf16.msra.mxu0 %v833_v34 }
  0x32   : > { %795 = vmatprep.subr.bf16.mxu0 %v846_v1 }
  0x35   : > { %796 = vmatpush3.bf16.msra.mxu0 %v834_v35 }
  0x36   : > { %797 = vmatprep.subr.bf16.mxu0 %v846_v1 }
  0x39   : > { %798 = vmatpush3.bf16.msra.mxu0 %v835_v36 }
  0x3a   : > { %799 = vmatprep.subr.bf16.mxu0 %v846_v1 }
  0x3d   : > { %800 = vmatpush3.bf16.msra.mxu0 %v836_v37 }
  0x3e   : > { %801 = vmatprep.subr.bf16.mxu0 %v846_v1 }
  0x41   : > { %802 = vmatpush3.bf16.msra.mxu0 %v837_v38 }
  0x44   : > { %804 = vmatmul.mubr.msk.bf16.vlgmr.msra.gmra.mxu0 %vm309_vm1, %v455_v39 }
  0xe8   : > { %v347_v41 = vpop.f32.mrf.mxu0 }
  0xe9   : > { %v432_v40 = vpop.f32.mrf.mxu1 }
  0xea   : > { %v769_v43 = vpop.f32.mrf.mxu0  ;;  %v433_v48 = vadd.f32 %v432_v40, %v347_v41 }
  0xeb   : > { %v787_v42 = vpop.f32.mrf.mxu1 }
  0xec   : > { %v350_v45 = vpop.f32.mrf.mxu0 }
  0xed   : > { %v435_v44 = vpop.f32.mrf.mxu1 }
  0xee   : > { %v770_v47 = vpop.f32.mrf.mxu0  ;;  %v436_v52 = vadd.f32 %v435_v44, %v350_v45 }
  0xef   : > { %v788_v46 = vpop.f32.mrf.mxu1 }
 0x104   : > { %v535_v49 = vpop.f32.mrf.mxu0 }
 0x105   : > { %v542_v50 = vadd.f32 %v535_v49, %v433_v48 }
 0x106   : > { %v805_v51 = vpop.f32.mrf.mxu0 }
 0x107   : > { %573 = vst.msk [vmem:[%s204_s22] sm:$0xff] %vm544_vm2, %v542_v50  ;;  %v545_v56 = vsel %vm544_vm2, %v542_v50, 0.0 }
 0x108   : > { %v538_v53 = vpop.f32.mrf.mxu0 }
 0x109   : > { %v543_v54 = vadd.f32 %v538_v53, %v436_v52 }
 0x10a   : > { %v806_v55 = vpop.f32.mrf.mxu0 }
 0x10b   : > { %v547_v57 = vsel %vm546_vm3, %v543_v54, 0.0  ;;  %574 = vst.msk [vmem:[%s204_s22 + $0x8] sm:$0xf] %vm546_vm3, %v543_v54 }
 0x10c   : > { %v548_v58 = vadd.f32 %v547_v57, %v545_v56 }
 0x10e   : > { %v549_v59 = vrot.slane %v548_v58, 4 }
 0x110   : > { %v550_v60 = vadd.f32 %v549_v59, %v548_v58 }
 0x112   : > { %v551_v61 = vrot.slane %v550_v60, 2 }
 0x114   : > { %v552_v62 = vadd.f32 %v551_v61, %v550_v60 }
 0x116   : > { %v553_v63 = vrot.slane %v552_v62, 1 }
 0x118   : > { %v554_v0 = vadd.f32 %v553_v63, %v552_v62 }
 0x11a   : > { %v555_v1 = vmul.f32 0.083333336, %v554_v0 }
 0x11c   : > { %v556_v2 = vsub.f32 %v542_v50, %v555_v1  ;;  %v557_v3 = vsub.f32 %v543_v54, %v555_v1 }
 0x11e   : > { %v558_v4 = vmul.f32 %v556_v2, %v556_v2  ;;  %v559_v5 = vmul.f32 %v557_v3, %v557_v3 }
 0x120   : > { %v560_v6 = vsel %vm544_vm2, %v558_v4, 0.0  ;;  %v561_v7 = vsel %vm546_vm3, %v559_v5, 0.0 }
 0x121   : > { %v562_v8 = vadd.f32 %v561_v7, %v560_v6 }
 0x123   : > { %v563_v9 = vrot.slane %v562_v8, 4 }
 0x125   : > { %v564_v10 = vadd.f32 %v563_v9, %v562_v8 }
 0x127   : > { %v565_v11 = vrot.slane %v564_v10, 2 }
 0x129   : > { %v566_v12 = vadd.f32 %v565_v11, %v564_v10 }
 0x12b   : > { %v567_v13 = vrot.slane %v566_v12, 1 }
 0x12d   : > { %v568_v14 = vadd.f32 %v567_v13, %v566_v12 }
 0x12f   : > { %v570_v15 = vsel %vm569_vm4, %v554_v0, %v568_v14 }
 0x130   : > { %572 = vst.msk [vmem:[%s208_s26] sm:$0x3] %vm571_vm5, %v570_v15 }
 0x131 PF: > { %s15_s15 = sadd.s32 1, %s844_s15  }
 0x132   : > { %p12_p4 = scmp.ge.s32.totalorder %s15_s15, 4  }
 0x134   :  { %14 = sbr.rel (!%p12_p4) target bundleno = 1 (0x1), region = 76 }

// kernel: tile.39
= control target key start
LH: loop header
LB: loop body
LE: loop exit
PB: predicated region body
PF: predicated region fallthrough
CT: control target
= control target key end

     0   :  { %s101_s10 = smov 88   ;;  %s102_s11 = smov 72   ;;  %vm3_vm0 = vcmask 64512   ;;  %vm9_vm1 = vcmask 786112   ;;  %vm15_vm2 = vcmask 720512   ;;  %vm21_vm3 = vcmask 654912   ;;  %s161_s0 = inlined_call_operand.vmem [shape: f32[12,8], index: 0, kind: input, shape index: {}]   ;;  %s162_s1 = inlined_call_operand.vmem [shape: f32[1,96], index: 1, kind: output, shape index: {}]  }
   0x1   :  { %v79_v0 = vld [vmem:[%s161_s0 + $0xb] sm:$0x1]   ;;  %v81_v1 = vld [vmem:[%s161_s0 + $0x9] sm:$0x1]   ;;  %v80_v2 = vld [vmem:[%s161_s0 + $0xa] sm:$0x1]  }
   0x2   :  { %7 = vrot.lane.b32.xlu0 %v79_v0, %s101_s10  ;;  %19 = vrot.lane.b32.xlu1 %v81_v1, %s102_s11  ;;  %v82_v3 = vld [vmem:[%s161_s0 + $0x8] sm:$0x1]   ;;  %s103_s16 = smov 80   ;;  %s104_s17 = smov 64   ;;  %v83_v4 = vld [vmem:[%s161_s0 + $0x7] sm:$0x1]  }
   0x3   :  { %v2_v5 = vld [vmem:[%s161_s0] sm:$0x1]   ;;  %v84_v6 = vld [vmem:[%s161_s0 + $0x6] sm:$0x1]   ;;  %s105_s24 = smov 56   ;;  %s106_s25 = smov 48  }
   0x4   :  { %4 = vst.msk [vmem:[#allocation0] sm:$0x1] %vm3_vm0, %v2_v5   ;;  %v85_v7 = vld [vmem:[%s161_s0 + $0x5] sm:$0x1]   ;;  %v86_v8 = vld [vmem:[%s161_s0 + $0x4] sm:$0x1]  }
   0x5   :  { %s107_s30 = smov 40   ;;  %s108_s2 = smov 32   ;;  %v87_v9 = vld [vmem:[%s161_s0 + $0x3] sm:$0x1]   ;;  %v88_v10 = vld [vmem:[%s161_s0 + $0x2] sm:$0x1]  }
   0x6   :  { %13 = vrot.lane.b32.xlu0 %v80_v2, %s103_s16  ;;  %25 = vrot.lane.b32.xlu1 %v82_v3, %s104_s17  ;;  %s109_s7 = smov 24   ;;  %s110_s8 = smov 16   ;;  %v89_v11 = vld [vmem:[%s161_s0 + $0x1] sm:$0x1]   ;;  %vm27_vm4 = vcmask 589312   ;;  %vm33_vm5 = vcmask 523712  }
   0x7   :  { %s111_s0 = smov 8   ;;  %vm39_vm6 = vcmask 458112   ;;  %vm45_vm7 = vcmask 392512   ;;  %vm51_vm8 = vcmask 326912   ;;  %vm57_vm9 = vcmask 261312  }
   0x8   :  { %vm63_vm10 = vcmask 195712   ;;  %vm69_vm11 = vcmask 130112  }
   0xa   :  { %31 = vrot.lane.b32.xlu0 %v83_v4, %s105_s24  ;;  %37 = vrot.lane.b32.xlu1 %v84_v6, %s106_s25 }
   0xe   :  { %43 = vrot.lane.b32.xlu0 %v85_v7, %s107_s30  ;;  %49 = vrot.lane.b32.xlu1 %v86_v8, %s108_s2 }
  0x12   :  { %55 = vrot.lane.b32.xlu0 %v87_v9, %s109_s7  ;;  %61 = vrot.lane.b32.xlu1 %v88_v10, %s110_s8 }
  0x16   :  { %67 = vrot.lane.b32.xlu0 %v89_v11, %s111_s0 }
  0x74   :  { %v8_v12 = vpop.permute.xlu0 %7   ;;  %v20_v13 = vpop.permute.xlu1 %19  }
  0x75   :  { %10 = vst.msk [vmem:[#allocation0] sm:$0x1] %vm9_vm1, %v8_v12  }
  0x78   :  { %v14_v14 = vpop.permute.xlu0 %13   ;;  %v26_v15 = vpop.permute.xlu1 %25  }
  0x79   :  { %16 = vst.msk [vmem:[#allocation0] sm:$0x1] %vm15_vm2, %v14_v14  }
  0x7a   :  { %22 = vst.msk [vmem:[#allocation0] sm:$0x1] %vm21_vm3, %v20_v13  }
  0x7b   :  { %28 = vst.msk [vmem:[#allocation0] sm:$0x1] %vm27_vm4, %v26_v15  }
  0x7c   :  { %v32_v16 = vpop.permute.xlu0 %31   ;;  %v38_v17 = vpop.permute.xlu1 %37  }
  0x7d   :  { %34 = vst.msk [vmem:[#allocation0] sm:$0x1] %vm33_vm5, %v32_v16  }
  0x7e   :  { %40 = vst.msk [vmem:[#allocation0] sm:$0x1] %vm39_vm6, %v38_v17  }
  0x80   :  { %v44_v18 = vpop.permute.xlu0 %43   ;;  %v50_v19 = vpop.permute.xlu1 %49  }
  0x81   :  { %46 = vst.msk [vmem:[#allocation0] sm:$0x1] %vm45_vm7, %v44_v18  }
  0x82   :  { %52 = vst.msk [vmem:[#allocation0] sm:$0x1] %vm51_vm8, %v50_v19  }
  0x84   :  { %v56_v20 = vpop.permute.xlu0 %55   ;;  %v62_v21 = vpop.permute.xlu1 %61  }
  0x85   :  { %58 = vst.msk [vmem:[#allocation0] sm:$0x1] %vm57_vm9, %v56_v20  }
  0x86   :  { %64 = vst.msk [vmem:[#allocation0] sm:$0x1] %vm63_vm10, %v62_v21  }
  0x88   :  { %v68_v22 = vpop.permute.xlu0 %67  }
  0x89   :  { %70 = vst.msk [vmem:[#allocation0] sm:$0x1] %vm69_vm11, %v68_v22  }
  0x90   :  { %v75_v23 = vld [vmem:[#allocation0] sm:$0x1] }
  0x91   :  { %78 = vst [vmem:[%s162_s1] sm:$0x1] %v75_v23 }

// kernel: double_conv2d_nhwc.5
= control target key start
LH: loop header
LB: loop body
LE: loop exit
PB: predicated region body
PF: predicated region fallthrough
CT: control target
= control target key end

     0   :  { %vm33_vm0 = vcmask 785408   ;;  %s82_s0 = inlined_call_operand.vmem [shape: f32[24,96], index: 0, kind: input, shape index: {}]   ;;  %s83_s1 = inlined_call_operand.vmem [shape: f32[2,96], index: 1, kind: input, shape index: {}]   ;;  %s84_s2 = inlined_call_operand.vmem [shape: f32[24,96], index: 2, kind: output, shape index: {}]  }
   0x1   :  { %v11_v0 = vld [vmem:[%s82_s0] sm:$0xff]  ;;  %v12_v4 = vld [vmem:[%s82_s0 + $0x8] sm:$0xff]  ;;  %v13_v5 = vld [vmem:[%s82_s0 + $0x10] sm:$0xff] }
   0x2   :  { %v41_v1 = vld [vmem:[%s83_s1] ss:$0 sm:$0xff]  ;;  %v42_v2 = vld [vmem:[%s83_s1 + $0x1] ss:$0 sm:$0xff] }
   0x3   :  { %v19_v3 = vmul.f32 %v41_v1, %v11_v0  ;;  %v20_v6 = vmul.f32 %v41_v1, %v12_v4  ;;  %v21_v7 = vmul.f32 %v41_v1, %v13_v5 }
   0x5   :  { %v27_v8 = vadd.f32 %v42_v2, %v19_v3  ;;  %v28_v9 = vadd.f32 %v42_v2, %v20_v6  ;;  %v29_v10 = vadd.f32 %v42_v2, %v21_v7 }
   0x7   :  { %v30_v11 = vmax.f32 %v27_v8, 0.0  ;;  %v31_v12 = vmax.f32 %v28_v9, 0.0  ;;  %v32_v13 = vmax.f32 %v29_v10, 0.0 }
   0x9   :  { %34 = vst.msk [vmem:[%s84_s2] sm:$0xff] %vm33_vm0, %v30_v11  ;;  %35 = vst.msk [vmem:[%s84_s2 + $0x8] sm:$0xff] %vm33_vm0, %v31_v12 }
   0xa   :  { %36 = vst.msk [vmem:[%s84_s2 + $0x10] sm:$0xff] %vm33_vm0, %v32_v13 }

</bundles_post_ra>
